<compile_context>
chip_gen: v6e
topology: v6e:2x2x1
jax: 0.10.0
libtpu: 0.0.40
codegen_flags: <defaults>
</compile_context>

<pallas_src>
import functools

import jax
import jax.numpy as jnp
from jax import lax
from jax.experimental import pallas as pl
from jax.experimental.pallas import tpu as pltpu


_LANE = 128
_VMEM_LIMIT = 48 * 1024 * 1024  # safe on v7x (64 MiB/TC), > v5e/v6e scoped defaults


def _attention_kernel(out_ref, ctx_ref, wmix_ref, wout_ref, b_ref,
                      y_ref, attn_ref, *, dim, lk_valid):
    # out_ref : (Bblk, Tq, D)      ctx_ref : (Bblk, Lk_pad, D)
    # wmix_ref/wout_ref : (D, D)   b_ref   : (1, D) f32
    # y_ref   : (Bblk, Tq, D)      attn_ref: (Bblk, Tq, Lk_pad)
    o = out_ref[...]                       # compute dtype (bf16 or f32)
    c = ctx_ref[...]
    bblk, tq, _ = o.shape
    lk_pad = c.shape[1]

    # scores = bmm(output, context^T): batched contraction over the feature
    # axis of BOTH operands (no explicit transpose). Operands at storage
    # dtype (bf16 on the fast path), f32 accumulation on the MXU.
    scores = jnp.einsum("bqd,bkd->bqk", o, c,
                        preferred_element_type=jnp.float32)   # (Bblk, Tq, Lk_pad)

    if lk_pad != lk_valid:
        # Mask the zero-padded key positions so softmax ignores them.
        col = lax.broadcasted_iota(jnp.int32, scores.shape, dimension=2)
        scores = jnp.where(col < lk_valid, scores, -jnp.inf)
    # TODO(synk): the module's optional set_mask()/masked_fill(-inf) path is
    # not implemented (mask is None in the default forward); it would be
    # applied here exactly like the padding mask above.

    # Softmax over keys — f32 math, EXACT reciprocal so the returned attention
    # weights match F.softmax (approx reciprocal caused the previous mismatch).
    m = jnp.max(scores, axis=-1, keepdims=True)
    e = jnp.exp(scores - m)
    denom = jnp.sum(e, axis=-1, keepdims=True)
    attn = e * (1.0 / denom)                                   # (Bblk, Tq, Lk_pad)
    attn_ref[...] = attn.astype(attn_ref.dtype)

    # mix = bmm(attn, context); feed MXU operands at the compute dtype.
    mix = jnp.einsum("bqk,bkd->bqd", attn.astype(c.dtype), c,
                     preferred_element_type=jnp.float32)       # (Bblk, Tq, D)

    # linear_out(cat([mix, output], -1)) without materializing the concat:
    # two K=D matmuls accumulated in f32, batch folded into the M dimension.
    mix2d = mix.reshape(bblk * tq, dim).astype(o.dtype)
    o2d = o.reshape(bblk * tq, dim)
    lin = (jnp.dot(mix2d, wmix_ref[...], preferred_element_type=jnp.float32)
           + jnp.dot(o2d, wout_ref[...], preferred_element_type=jnp.float32)
           + b_ref[...].astype(jnp.float32))                   # (Bblk*Tq, D)
    y_ref[...] = jnp.tanh(lin).reshape(bblk, tq, dim).astype(y_ref.dtype)


def _round_up(x, m):
    return (x + m - 1) // m * m


def _pick_tile_q(lq, max_tile=256):
    """Tile the query axis; keep it whole when small, else a divisor <= 256."""
    if lq <= max_tile:
        return lq
    for t in range(max_tile, 0, -8):        # multiples of 8, descending
        if lq % t == 0:
            return t
    return lq


def _pick_batch_block(b, tile_q, lk_pad, d, act_bytes, attn_bytes,
                      vmem_budget=int(_VMEM_LIMIT * 0.85)):
    """Largest divisor of b whose double-buffered tiles fit the VMEM budget,
    keeping grid extent >= 2 so both v7x TensorCores get work."""
    per_b = (2 * act_bytes * (2 * tile_q * d + lk_pad * d)   # out/y + ctx (x2 bufs)
             + 2 * attn_bytes * tile_q * lk_pad)             # attn (x2 bufs)
    fixed = 2 * (2 * d * d * act_bytes) + 2 * 4 * d          # weights + bias
    best = 1
    for cand in range(1, b + 1):
        if b % cand:
            continue
        if b >= 2 and b // cand < 2:
            continue                                         # keep >= 2 grid steps
        if cand * per_b + fixed <= vmem_budget:
            best = cand
    return best


def attention_forward(output, context, weight, bias, *,
                      compute_dtype=None, attn_dtype=None, batch_block=None):
    """output: (B, Lq, D), context: (B, Lk, D),
    weight: (D, 2D) as in torch.nn.Linear(2D, D), bias: (D,)."""
    B, Lq, D = output.shape
    Bc, Lk, Dc = context.shape
    assert Bc == B and Dc == D, "output/context batch or feature mismatch"
    assert weight.shape == (D, 2 * D), "expect torch nn.Linear(2D, D) weight layout"
    assert bias.shape == (D,)

    if compute_dtype is None:
        compute_dtype = output.dtype        # pass jnp.bfloat16 for the fast MXU path
    if attn_dtype is None:
        attn_dtype = output.dtype

    # Split the (D, 2D) Linear weight into its mix/output halves and pre-
    # transpose so the kernel runs two K=D matmuls (no concat).
    w = jnp.asarray(weight)
    w_mix = w[:, :D].T.astype(compute_dtype)      # (D, D) multiplies `mix`
    w_out = w[:, D:].T.astype(compute_dtype)      # (D, D) multiplies `output`
    b2 = jnp.asarray(bias).reshape(1, D).astype(jnp.float32)

    out_c = jnp.asarray(output).astype(compute_dtype)
    ctx_c = jnp.asarray(context).astype(compute_dtype)

    # Lane-dense attn output: pad keys to a multiple of 128; padded keys are
    # masked to -inf in-kernel and the padding is sliced off afterwards.
    Lk_pad = _round_up(Lk, _LANE)
    if Lk_pad != Lk:
        ctx_c = jnp.pad(ctx_c, ((0, 0), (0, Lk_pad - Lk), (0, 0)))
    # TODO(synk): D < 128 leaves the y store lane-sparse; padding D would also
    # require padding the linear weights, so it is left unpadded here.

    tile_q = _pick_tile_q(Lq)
    act_bytes = jnp.dtype(compute_dtype).itemsize
    attn_bytes = jnp.dtype(attn_dtype).itemsize
    if batch_block is None:
        batch_block = _pick_batch_block(B, tile_q, Lk_pad, D, act_bytes, attn_bytes)
    assert B % batch_block == 0, "batch_block must divide B"
    Bblk = batch_block

    kernel = functools.partial(_attention_kernel, dim=D, lk_valid=Lk)

    grid_spec = pltpu.PrefetchScalarGridSpec(
        num_scalar_prefetch=0,
        grid=(B // Bblk, Lq // tile_q),
        in_specs=[
            pl.BlockSpec((Bblk, tile_q, D), lambda i, q: (i, q, 0)),   # output
            pl.BlockSpec((Bblk, Lk_pad, D), lambda i, q: (i, 0, 0)),   # context
            pl.BlockSpec((D, D), lambda i, q: (0, 0)),                 # W_mix^T
            pl.BlockSpec((D, D), lambda i, q: (0, 0)),                 # W_out^T
            pl.BlockSpec((1, D), lambda i, q: (0, 0)),                 # bias
        ],
        out_specs=[
            pl.BlockSpec((Bblk, tile_q, D), lambda i, q: (i, q, 0)),       # y
            pl.BlockSpec((Bblk, tile_q, Lk_pad), lambda i, q: (i, q, 0)),  # attn
        ],
    )
    # TODO(synk): if DMA time is still exposed at large shapes, add
    # pipeline_mode=pl.Buffered(3) on the output/context in_specs.

    out_shapes = (
        jax.ShapeDtypeStruct((B, Lq, D), output.dtype),
        jax.ShapeDtypeStruct((B, Lq, Lk_pad), attn_dtype),
    )

    y, attn_padded = pl.pallas_call(
        kernel,
        grid_spec=grid_spec,
        out_shape=out_shapes,
        compiler_params=pltpu.CompilerParams(
            dimension_semantics=("parallel", "parallel"),
            vmem_limit_bytes=_VMEM_LIMIT,
        ),
    )(out_c, ctx_c, w_mix, w_out, b2)

    attn = attn_padded[:, :, :Lk] if Lk_pad != Lk else attn_padded
    return y, attn


def attention_reference(output, context, weight, bias):
    """Pure-JAX reference mirroring the PyTorch forward (mask=None)."""
    attn = jnp.einsum("bqd,bkd->bqk", output, context)
    attn = jax.nn.softmax(attn, axis=-1)
    mix = jnp.einsum("bqk,bkd->bqd", attn, context)
    combined = jnp.concatenate([mix, output], axis=-1)
    lin = combined @ weight.T + bias
    return jnp.tanh(lin), attn


if __name__ == "__main__":
    key = jax.random.PRNGKey(0)
    B, Lq, Lk, D = 2, 8, 8, 32

    k1, k2, k3, k4 = jax.random.split(key, 4)
    output = jax.random.normal(k1, (B, Lq, D), dtype=jnp.float32)
    context = jax.random.normal(k2, (B, Lk, D), dtype=jnp.float32)
    # nn.Linear(2*D, D): weight (D, 2D), bias (D,), uniform(-1/sqrt(2D), 1/sqrt(2D))
    bound = 1.0 / jnp.sqrt(jnp.asarray(2 * D, jnp.float32))
    weight = jax.random.uniform(k3, (D, 2 * D), minval=-bound, maxval=bound,
                                dtype=jnp.float32)
    bias = jax.random.uniform(k4, (D,), minval=-bound, maxval=bound,
                              dtype=jnp.float32)

    # --- f32 path: must match the PyTorch float32 forward closely. ---
    y, attn = attention_forward(output, context, weight, bias)
    y = jax.block_until_ready(y)
    attn = jax.block_until_ready(attn)
    y_ref, attn_ref = attention_reference(output, context, weight, bias)
    assert y.shape == (B, Lq, D) and attn.shape == (B, Lq, Lk)
    assert jnp.allclose(y, y_ref, atol=1e-3, rtol=1e-3), "output mismatch"
    assert jnp.allclose(attn, attn_ref, atol=1e-3, rtol=1e-3), "attn mismatch"

    # --- bf16 MXU path (perf config): compare against a reference computed on
    # bf16-rounded inputs with f32 math. ---
    y16, attn16 = attention_forward(output, context, weight, bias,
                                    compute_dtype=jnp.bfloat16)
    y16 = jax.block_until_ready(y16)
    attn16 = jax.block_until_ready(attn16)
    o_r = output.astype(jnp.bfloat16).astype(jnp.float32)
    c_r = context.astype(jnp.bfloat16).astype(jnp.float32)
    w_r = weight.astype(jnp.bfloat16).astype(jnp.float32)
    y_ref16, attn_ref16 = attention_reference(o_r, c_r, w_r, bias)
    assert jnp.allclose(y16.astype(jnp.float32), y_ref16,
                        atol=3e-2, rtol=3e-2), "bf16 output mismatch"
    assert jnp.allclose(attn16.astype(jnp.float32), attn_ref16,
                        atol=3e-2, rtol=3e-2), "bf16 attn mismatch"

    print("KERNEL_OK")
</pallas_src>

<mosaic_0001>
module attributes {stable_mosaic.version = 11 : i64} {
  func.func @_attention_kernel(%arg0: i32, %arg1: i32, %arg2: memref<1x8x32xf32, #tpu.memory_space<vmem>>, %arg3: memref<1x128x32xf32, #tpu.memory_space<vmem>>, %arg4: memref<32x32xf32, #tpu.memory_space<vmem>>, %arg5: memref<32x32xf32, #tpu.memory_space<vmem>>, %arg6: memref<1x32xf32, #tpu.memory_space<vmem>>, %arg7: memref<1x8x32xf32, #tpu.memory_space<vmem>>, %arg8: memref<1x8x128xf32, #tpu.memory_space<vmem>>) attributes {dimension_semantics = [#tpu.dimension_semantics<parallel>, #tpu.dimension_semantics<parallel>], iteration_bounds = array<i64: 2, 1>, scalar_prefetch = 0 : i64, scratch_operands = 0 : i64, tpu.core_type = #tpu.core_type<tc>, window_params = [{transform_indices = @transform_0, window_bounds = array<i64: 1, 8, 32>}, {transform_indices = @transform_1, window_bounds = array<i64: 1, 128, 32>}, {pipeline_mode = #tpu.pipeline_mode<synchronous>, transform_indices = @transform_2, window_bounds = array<i64: 32, 32>}, {pipeline_mode = #tpu.pipeline_mode<synchronous>, transform_indices = @transform_3, window_bounds = array<i64: 32, 32>}, {pipeline_mode = #tpu.pipeline_mode<synchronous>, transform_indices = @transform_4, window_bounds = array<i64: 1, 32>}, {transform_indices = @transform_5, window_bounds = array<i64: 1, 8, 32>}, {transform_indices = @transform_6, window_bounds = array<i64: 1, 8, 128>}]} {
    %c0 = arith.constant 0 : index
    %c0_0 = arith.constant 0 : index
    %c0_1 = arith.constant 0 : index
    %0 = vector.load %arg2[%c0, %c0_0, %c0_1] : memref<1x8x32xf32, #tpu.memory_space<vmem>>, vector<1x8x32xf32>
    %c0_2 = arith.constant 0 : index
    %c0_3 = arith.constant 0 : index
    %c0_4 = arith.constant 0 : index
    %1 = vector.load %arg3[%c0_2, %c0_3, %c0_4] : memref<1x128x32xf32, #tpu.memory_space<vmem>>, vector<1x128x32xf32>
    "tpu.trace_start"() <{level = 10 : i32, message = "bqd,bkd->bqk"}> : () -> ()
    %cst = arith.constant dense<0.000000e+00> : vector<1x8x128xf32>
    %2 = tpu.matmul %0, %1, %cst {dimension_numbers = #tpu.dot_dimension_numbers<[2], [2], [1], [1], [0, 0, 0, 1, 1, 1], [0], [0]>} : vector<1x8x32xf32>, vector<1x128x32xf32>, vector<1x8x128xf32> -> vector<1x8x128xf32>
    "tpu.trace_stop"() : () -> ()
    %3 = tpu.iota {dimensions = array<i32: 2>} : vector<1x8x128xi32>
    %c8_i32 = arith.constant 8 : i32
    %4 = vector.broadcast %c8_i32 : i32 to vector<1x8x128xi32>
    %5 = arith.cmpi slt, %3, %4 : vector<1x8x128xi32>
    %cst_5 = arith.constant 0xFF800000 : f32
    %6 = vector.broadcast %cst_5 : f32 to vector<1x8x128xf32>
    %7 = arith.select %5, %2, %6 : vector<1x8x128xi1>, vector<1x8x128xf32>
    %cst_6 = arith.constant dense<0xFF800000> : vector<1x8xf32>
    %8 = vector.multi_reduction <maximumf>, %7, %cst_6 [2] : vector<1x8x128xf32> to vector<1x8xf32>
    %9 = vector.shape_cast %8 : vector<1x8xf32> to vector<1x8x1xf32>
    %10 = vector.broadcast %9 : vector<1x8x1xf32> to vector<1x8x128xf32>
    %11 = arith.subf %7, %10 : vector<1x8x128xf32>
    %12 = math.exp %11 : vector<1x8x128xf32>
    %cst_7 = arith.constant dense<0.000000e+00> : vector<1x8xf32>
    %13 = vector.multi_reduction <add>, %12, %cst_7 [2] : vector<1x8x128xf32> to vector<1x8xf32>
    %14 = vector.shape_cast %13 : vector<1x8xf32> to vector<1x8x1xf32>
    %cst_8 = arith.constant 1.000000e+00 : f32
    %15 = vector.broadcast %cst_8 : f32 to vector<1x8x1xf32>
    %16 = arith.divf %15, %14 : vector<1x8x1xf32>
    %17 = vector.broadcast %16 : vector<1x8x1xf32> to vector<1x8x128xf32>
    %18 = arith.mulf %12, %17 : vector<1x8x128xf32>
    %c0_9 = arith.constant 0 : index
    %c0_10 = arith.constant 0 : index
    %c0_11 = arith.constant 0 : index
    %19 = vector.load %arg8[%c0_9, %c0_10, %c0_11] : memref<1x8x128xf32, #tpu.memory_space<vmem>>, vector<1x8x128xf32>
    tpu.vector_store %arg8[%c0_9, %c0_10, %c0_11], %18 {strides = array<i32>} : memref<1x8x128xf32, #tpu.memory_space<vmem>>, vector<1x8x128xf32>,
    "tpu.trace_start"() <{level = 10 : i32, message = "bqk,bkd->bqd"}> : () -> ()
    %cst_12 = arith.constant dense<0.000000e+00> : vector<1x8x32xf32>
    %20 = tpu.matmul %18, %1, %cst_12 {dimension_numbers = #tpu.dot_dimension_numbers<[2], [1], [1], [2], [0, 0, 0, 1, 1, 2], [0], [0]>} : vector<1x8x128xf32>, vector<1x128x32xf32>, vector<1x8x32xf32> -> vector<1x8x32xf32>
    "tpu.trace_stop"() : () -> ()
    %21 = vector.shape_cast %20 : vector<1x8x32xf32> to vector<8x32xf32>
    %22 = vector.shape_cast %0 : vector<1x8x32xf32> to vector<8x32xf32>
    %c0_13 = arith.constant 0 : index
    %c0_14 = arith.constant 0 : index
    %23 = vector.load %arg4[%c0_13, %c0_14] : memref<32x32xf32, #tpu.memory_space<vmem>>, vector<32x32xf32>
    %cst_15 = arith.constant dense<0.000000e+00> : vector<8x32xf32>
    %24 = tpu.matmul %21, %23, %cst_15 {dimension_numbers = #tpu.dot_dimension_numbers<[1], [0], [0], [1], [0, 0, 1, 1], [], []>} : vector<8x32xf32>, vector<32x32xf32>, vector<8x32xf32> -> vector<8x32xf32>
    %c0_16 = arith.constant 0 : index
    %c0_17 = arith.constant 0 : index
    %25 = vector.load %arg5[%c0_16, %c0_17] : memref<32x32xf32, #tpu.memory_space<vmem>>, vector<32x32xf32>
    %cst_18 = arith.constant dense<0.000000e+00> : vector<8x32xf32>
    %26 = tpu.matmul %22, %25, %cst_18 {dimension_numbers = #tpu.dot_dimension_numbers<[1], [0], [0], [1], [0, 0, 1, 1], [], []>} : vector<8x32xf32>, vector<32x32xf32>, vector<8x32xf32> -> vector<8x32xf32>
    %27 = arith.addf %24, %26 : vector<8x32xf32>
    %c0_19 = arith.constant 0 : index
    %c0_20 = arith.constant 0 : index
    %28 = vector.load %arg6[%c0_19, %c0_20] : memref<1x32xf32, #tpu.memory_space<vmem>>, vector<1x32xf32>
    %29 = vector.broadcast %28 : vector<1x32xf32> to vector<8x32xf32>
    %30 = arith.addf %27, %29 : vector<8x32xf32>
    %31 = math.tanh %30 : vector<8x32xf32>
    %32 = vector.shape_cast %31 : vector<8x32xf32> to vector<1x8x32xf32>
    %c0_21 = arith.constant 0 : index
    %c0_22 = arith.constant 0 : index
    %c0_23 = arith.constant 0 : index
    %33 = vector.load %arg7[%c0_21, %c0_22, %c0_23] : memref<1x8x32xf32, #tpu.memory_space<vmem>>, vector<1x8x32xf32>
    tpu.vector_store %arg7[%c0_21, %c0_22, %c0_23], %32 {strides = array<i32>} : memref<1x8x32xf32, #tpu.memory_space<vmem>>, vector<1x8x32xf32>,
    return
  }
  func.func @transform_0(%arg0: i32, %arg1: i32) -> (i32, i32, i32) {
    %c0_i32 = arith.constant 0 : i32
    %c0_i32_0 = arith.constant 0 : i32
    return %arg0, %arg1, %c0_i32 : i32, i32, i32
  }
  func.func @transform_1(%arg0: i32, %arg1: i32) -> (i32, i32, i32) {
    %c0_i32 = arith.constant 0 : i32
    %c0_i32_0 = arith.constant 0 : i32
    %c0_i32_1 = arith.constant 0 : i32
    return %arg0, %c0_i32, %c0_i32_0 : i32, i32, i32
  }
  func.func @transform_2(%arg0: i32, %arg1: i32) -> (i32, i32) {
    %c0_i32 = arith.constant 0 : i32
    %c0_i32_0 = arith.constant 0 : i32
    %c0_i32_1 = arith.constant 0 : i32
    return %c0_i32, %c0_i32_0 : i32, i32
  }
  func.func @transform_3(%arg0: i32, %arg1: i32) -> (i32, i32) {
    %c0_i32 = arith.constant 0 : i32
    %c0_i32_0 = arith.constant 0 : i32
    %c0_i32_1 = arith.constant 0 : i32
    return %c0_i32, %c0_i32_0 : i32, i32
  }
  func.func @transform_4(%arg0: i32, %arg1: i32) -> (i32, i32) {
    %c0_i32 = arith.constant 0 : i32
    %c0_i32_0 = arith.constant 0 : i32
    %c0_i32_1 = arith.constant 0 : i32
    return %c0_i32, %c0_i32_0 : i32, i32
  }
  func.func @transform_5(%arg0: i32, %arg1: i32) -> (i32, i32, i32) {
    %c0_i32 = arith.constant 0 : i32
    %c0_i32_0 = arith.constant 0 : i32
    return %arg0, %arg1, %c0_i32 : i32, i32, i32
  }
  func.func @transform_6(%arg0: i32, %arg1: i32) -> (i32, i32, i32) {
    %c0_i32 = arith.constant 0 : i32
    %c0_i32_0 = arith.constant 0 : i32
    return %arg0, %arg1, %c0_i32 : i32, i32, i32
  }
}

</mosaic_0001>

<bundles_post_ra>
// kernel: tpu_custom_call.1
= control target key start
LH: loop header
LB: loop body
LE: loop exit
PB: predicated region body
PF: predicated region fallthrough
CT: control target
= control target key end

     0   :  { %12 = vsyncpa [#allocation3], 0  ;;  %s1485_s0 = inlined_call_operand.vmem [shape: f32[2,8,32], index: 0, kind: input, shape index: {}]   ;;  %s1486_s1 = inlined_call_operand.vmem [shape: f32[2,128,32], index: 1, kind: input, shape index: {}]   ;;  %s1487_s2 = inlined_call_operand.vmem [shape: f32[32,32], index: 2, kind: input, shape index: {}]   ;;  %s1488_s3 = inlined_call_operand.vmem [shape: f32[32,32], index: 3, kind: input, shape index: {}]   ;;  %s1489_s4 = inlined_call_operand.vmem [shape: f32[1,32], index: 4, kind: input, shape index: {}]   ;;  %s1490_s5 = inlined_call_operand.hbm [shape: f32[2,8,32], index: 5, kind: output, shape index: {0}]   ;;  %s1491_s6 = inlined_call_operand.hbm [shape: f32[2,8,128], index: 6, kind: output, shape index: {1}]  }
   0x1   :  { %14 = vsyncpa [#allocation3 + $0x1], 0 }
   0x2   :  { %15 = vsyncpa [#allocation5], 0 }
   0x3   :  { %17 = vsyncpa [#allocation5 + $0x1], 0  ;;  %s1228_s21 = smov 0   ;;  %s1230_s22 = smov 0  }
   0x4   :  { %s1232_s23 = smov 0   ;;  %s1234_s24 = smov 0  }
   0x5   :  { %s1236_s25 = smov 0   ;;  %s1238_s26 = smov 0  }
   0x6 LB: > { %s840_s27 = sadd.s32 4294967295, %s1187_s26   ;;  %s841_s28 = sadd.s32 4294967294, %s1187_s26   ;;  %s1187_s26 = sphi %s1238_s26, %s23_s26   ;;  %s1183_s25 = sphi %s1236_s25, %s1502_s25   ;;  %s1179_s24 = sphi %s1234_s24, %s1501_s24   ;;  %s1175_s23 = sphi %s1232_s23, %s1500_s23   ;;  %s1171_s22 = sphi %s1230_s22, %s1499_s22   ;;  %s1167_s21 = sphi %s1228_s21, %s1498_s21  }
   0x7   : > { %s35_s29 = sadd.s32 1, %s1183_s25  ;;  %s161_s30 = sadd.s32 1, %s1175_s23 }
   0x8   : > { %p37_p0 = scmp.ge.s32.totalorder %s35_s29, 2  ;;  %p171_p1 = scmp.ne.s32.totalorder %s1175_s23, %s1171_s22 }
   0x9   : > { %p172_p2 = scmp.eq.s32.totalorder %s840_s27, 1  ;;  %p177_p3 = scmp.ne.s32.totalorder %s1171_s22, %s1167_s21 }
   0xa   : > { %s1504_s29 = smov (%p37_p0, %s35_s29), 0  ;;  %p178_p5 = scmp.eq.s32.totalorder %s841_s28, 1 }
   0xb   : > { %p1268_p4 = por %p172_p2, %p171_p1  ;;  %s156_s8 = ssub.s32 %s1183_s25, %s1504_s29 }
   0xc   : > { %p844_p6 = scmp.ge.s32.totalorder %s1187_s26, 1  ;;  %p159_p7 = scmp.eq.s32.totalorder %s156_s8, 0 }
   0xd   : > { %p1275_p8 = por %p178_p5, %p177_p3  ;;  %p251_p9 = scmp.lt.s32.totalorder %s1187_s26, 3 }
   0xe   : > { %s1281_s10 = scalar_select %p159_p7, %s1175_s23, %s161_s30  }
   0xf   : > { %p252_p10 = pnand %p844_p6, %p251_p9 }
  0x10   : > { %p293_p11 = scmp.lt.s32.totalorder (!%p252_p10), %s1179_s24, 1  ;;  %s1368_s20 = sand.u32 (!%p252_p10), 1, %s1171_s22  }
  0x11   : > { %255 = sbr.rel (%p252_p10) target bundleno = 1011 (0x3f3), region = 40  ;;  %s1493_s27 = sshll.u32 (!%p252_p10), %s1368_s20, 3 }
  0x12   : > { %s1492_s14 = sshll.u32 (!%p252_p10), %s1179_s24, 7  ;;  %s1191_s30 = smov (!%p252_p10), [#allocation4]  }
  0x13   : > { %s722_s17 = scalar_lea.hbm (!%p252_p10), %s1491_s6, %s1492_s14  ;;  %s1085_s8 = sshll.u32 (!%p252_p10), %s1191_s30, 4  ;;  %s1086_s8 = int_to_ptr.vmem [resolvable:$false] %s1085_s8 }
  0x16   : > { %v1189_v0 = vmov 0.0   ;;  %vm1190_vm0 = vmmov 0   ;;  %s1288_s11 = scalar_select %p293_p11, %s1179_s24, 1  ;;  %vm322_vm1 = vcmask 261120   ;;  %v444_v18 = vlaneseq  ;;  %v536_v30 = vld [vmem:[%s1488_s3 + $0x18] sm:$0xff]  ;;  %v535_v31 = vld [vmem:[%s1488_s3 + $0x10] sm:$0xff] }
  0x17   : > { %921 = vmatprep.subr.mxu0 %v1189_v0  ;;  %953 = vmatprep.mubr.msk.f32.mxu0 %vm1190_vm0, %v1189_v0  ;;  %v534_v32 = vld [vmem:[%s1488_s3 + $0x8] sm:$0xff]  ;;  %v533_v33 = vld [vmem:[%s1488_s3] sm:$0xff]  ;;  %v532_v34 = vld [vmem:[%s1487_s2 + $0x18] sm:$0xff] }
  0x18   : > { %956 = vmatprep.subr.mxu1 %v1189_v0  ;;  %988 = vmatprep.mubr.msk.f32.mxu1 %vm1190_vm0, %v1189_v0  ;;  %s876_s12 = sshll.u32 %s1288_s11, 7  ;;  %s847_s16 = sshll.u32 %s1288_s11, 3  ;;  %v445_v19 = vand.u32 127, %v444_v18  ;;  %v531_v35 = vld [vmem:[%s1487_s2 + $0x10] sm:$0xff]  ;;  %v530_v36 = vld [vmem:[%s1487_s2 + $0x8] sm:$0xff]  ;;  %v529_v37 = vld [vmem:[%s1487_s2] sm:$0xff] }
  0x19   : > { %s1297_s15 = scalar_lea.vmem %s1486_s1, %s876_s12  ;;  %s299_s19 = scalar_lea.vmem %s1485_s0, %s847_s16 }
  0x1a   : > { %v321_v1 = vld [vmem:[%s1297_s15 + $0x78] sm:$0xff]  ;;  %v320_v2 = vld [vmem:[%s1297_s15 + $0x70] sm:$0xff]  ;;  %v319_v3 = vld [vmem:[%s1297_s15 + $0x68] sm:$0xff]  ;;  %vm446_vm2 = vcmp.lt.s32.totalorder %v445_v19, 8  ;;  %s1379_s12 = scalar_lea.vmem [#allocation4], %s1493_s27  ;;  %s1087_s11 = scalar_lea.vmem %s1086_s8, 256 }
  0x1b   : > { %922 = vmatpush3.xpose.msk.msra.mxu0 %vm322_vm1, %v321_v1  ;;  %957 = vmatpush3.msra.mxu1 %v321_v1  ;;  %v318_v4 = vld [vmem:[%s1297_s15 + $0x60] sm:$0xff]  ;;  %v317_v5 = vld [vmem:[%s1297_s15 + $0x58] sm:$0xff]  ;;  %v316_v6 = vld [vmem:[%s1297_s15 + $0x50] sm:$0xff]  ;;  %s724_s18 = sshll.u32 %s1379_s12, 4  ;;  %s725_s18 = int_to_ptr.vmem [resolvable:$true] %s724_s18 }
  0x1c   : > { %923 = vmatprep.subr.mxu0 %v1189_v0  ;;  %958 = vmatprep.subr.mxu1 %v1189_v0  ;;  %v315_v7 = vld [vmem:[%s1297_s15 + $0x48] sm:$0xff]  ;;  %v314_v8 = vld [vmem:[%s1297_s15 + $0x40] sm:$0xff]  ;;  %v313_v9 = vld [vmem:[%s1297_s15 + $0x38] sm:$0xff]  ;;  %s1081_s28 = scalar_lea.vmem %s725_s18, 128  ;;  %p1088_p1 = scmp.lt.s32.totalorder %s725_s18, %s1086_s8 }
  0x1d   : > { %959 = vmatpush3.msra.mxu1 %v320_v2  ;;  %v312_v10 = vld [vmem:[%s1297_s15 + $0x30] sm:$0xff]  ;;  %v311_v11 = vld [vmem:[%s1297_s15 + $0x28] sm:$0xff]  ;;  %v310_v12 = vld [vmem:[%s1297_s15 + $0x20] sm:$0xff]  ;;  %p1082_p12 = scmp.ne.s32.totalorder %s725_s18, %s1081_s28  ;;  %p1089_p2 = scmp.lt.s32.totalorder %s1087_s11, %s1081_s28 }
  0x1e   : > { %960 = vmatprep.subr.mxu1 %v1189_v0  ;;  %v309_v13 = vld [vmem:[%s1297_s15 + $0x18] sm:$0xff]  ;;  %v308_v14 = vld [vmem:[%s1297_s15 + $0x10] sm:$0xff]  ;;  %v307_v15 = vld [vmem:[%s1297_s15 + $0x8] sm:$0xff] }
  0x1f   : > { %924 = vmatpush3.xpose.msk.msra.mxu0 %vm322_vm1, %v320_v2  ;;  %961 = vmatpush3.msra.mxu1 %v319_v3  ;;  %v306_v16 = vld [vmem:[%s1297_s15] sm:$0xff]  ;;  %p1083_p13 = pnand %p1082_p12, %p1268_p4  ;;  %p1090_p3 = por %p1089_p2, %p1088_p1 }
  0x20   : > { %925 = vmatprep.subr.mxu0 %v1189_v0  ;;  %962 = vmatprep.subr.mxu1 %v1189_v0  ;;  %v305_v17 = vld [vmem:[%s299_s19] sm:$0xff]  ;;  %s696_s19 = scalar_lea.sflag [#allocation5], %s1368_s20 }
  0x21   : > { %963 = vmatpush3.msra.mxu1 %v318_v4  ;;  %p1084_p0 = pneg %p1083_p13 }
  0x22   : > { %964 = vmatprep.subr.mxu1 %v1189_v0 }
  0x23   : > { %926 = vmatpush3.xpose.msk.msra.mxu0 %vm322_vm1, %v319_v3  ;;  %965 = vmatpush3.msra.mxu1 %v317_v5  ;;  %p1091_p5 = pnand %p1090_p3, %p1084_p0 }
  0x24   : > { %927 = vmatprep.subr.mxu0 %v1189_v0  ;;  %966 = vmatprep.subr.mxu1 %v1189_v0 }
  0x25   : > { %967 = vmatpush3.msra.mxu1 %v316_v6 }
  0x26   : > { %968 = vmatprep.subr.mxu1 %v1189_v0 }
  0x27   : > { %928 = vmatpush3.xpose.msk.msra.mxu0 %vm322_vm1, %v318_v4  ;;  %969 = vmatpush3.msra.mxu1 %v315_v7 }
  0x28   : > { %929 = vmatprep.subr.mxu0 %v1189_v0  ;;  %970 = vmatprep.subr.mxu1 %v1189_v0 }
  0x29   : > { %971 = vmatpush3.msra.mxu1 %v314_v8 }
  0x2a   : > { %972 = vmatprep.subr.mxu1 %v1189_v0 }
  0x2b   : > { %930 = vmatpush3.xpose.msk.msra.mxu0 %vm322_vm1, %v317_v5  ;;  %973 = vmatpush3.msra.mxu1 %v313_v9 }
  0x2c   : > { %931 = vmatprep.subr.mxu0 %v1189_v0  ;;  %974 = vmatprep.subr.mxu1 %v1189_v0 }
  0x2d   : > { %975 = vmatpush3.msra.mxu1 %v312_v10 }
  0x2e   : > { %976 = vmatprep.subr.mxu1 %v1189_v0 }
  0x2f   : > { %932 = vmatpush3.xpose.msk.msra.mxu0 %vm322_vm1, %v316_v6  ;;  %977 = vmatpush3.msra.mxu1 %v311_v11 }
  0x30   : > { %933 = vmatprep.subr.mxu0 %v1189_v0  ;;  %978 = vmatprep.subr.mxu1 %v1189_v0 }
  0x31   : > { %979 = vmatpush3.msra.mxu1 %v310_v12 }
  0x32   : > { %980 = vmatprep.subr.mxu1 %v1189_v0 }
  0x33   : > { %934 = vmatpush3.xpose.msk.msra.mxu0 %vm322_vm1, %v315_v7  ;;  %981 = vmatpush3.msra.mxu1 %v309_v13 }
  0x34   : > { %935 = vmatprep.subr.mxu0 %v1189_v0  ;;  %982 = vmatprep.subr.mxu1 %v1189_v0 }
  0x35   : > { %983 = vmatpush3.msra.mxu1 %v308_v14 }
  0x36   : > { %984 = vmatprep.subr.mxu1 %v1189_v0 }
  0x37   : > { %936 = vmatpush3.xpose.msk.msra.mxu0 %vm322_vm1, %v314_v8  ;;  %985 = vmatpush3.msra.mxu1 %v307_v15 }
  0x38   : > { %937 = vmatprep.subr.mxu0 %v1189_v0  ;;  %986 = vmatprep.subr.mxu1 %v1189_v0 }
  0x39   : > { %987 = vmatpush3.msra.mxu1 %v306_v16 }
  0x3a   : > { %991 = vmatprep.subr.mxu1 %v1189_v0 }
  0x3b   : > { %938 = vmatpush3.xpose.msk.msra.mxu0 %vm322_vm1, %v313_v9 }
  0x3c   : > { %939 = vmatprep.subr.mxu0 %v1189_v0 }
  0x3f   : > { %940 = vmatpush3.xpose.msk.msra.mxu0 %vm322_vm1, %v312_v10 }
  0x40   : > { %941 = vmatprep.subr.mxu0 %v1189_v0 }
  0x43   : > { %942 = vmatpush3.xpose.msk.msra.mxu0 %vm322_vm1, %v311_v11 }
  0x44   : > { %943 = vmatprep.subr.mxu0 %v1189_v0 }
  0x47   : > { %944 = vmatpush3.xpose.msk.msra.mxu0 %vm322_vm1, %v310_v12 }
  0x48   : > { %945 = vmatprep.subr.mxu0 %v1189_v0 }
  0x4b   : > { %946 = vmatpush3.xpose.msk.msra.mxu0 %vm322_vm1, %v309_v13 }
  0x4c   : > { %947 = vmatprep.subr.mxu0 %v1189_v0 }
  0x4f   : > { %948 = vmatpush3.xpose.msk.msra.mxu0 %vm322_vm1, %v308_v14 }
  0x50   : > { %949 = vmatprep.subr.mxu0 %v1189_v0 }
  0x53   : > { %950 = vmatpush3.xpose.msk.msra.mxu0 %vm322_vm1, %v307_v15 }
  0x54   : > { %951 = vmatprep.subr.mxu0 %v1189_v0 }
  0x57   : > { %952 = vmatpush3.xpose.msk.msra.mxu0 %vm322_vm1, %v306_v16 }
  0x5a   : > { %954 = vmatmul.mubr.msk.f32.vlgmr.msra.gmra.mxu0 %vm322_vm1, %v305_v17 }
 0x11a   : > { %v440_v20 = vpop.f32.mrf.mxu0 }
 0x11b   : > { %v447_v21 = vsel %vm446_vm2, %v440_v20, -inf }
 0x11c   : > { %448 = vmax.xlane.f32.xlu0 %v447_v21  ;;  %v955_v22 = vpop.f32.mrf.mxu0 }
 0x1a5   : > { %v449_v23 = vpop.xlane.xlu0 %448 }
 0x1a6   : > { %v450_v24 = vsub.f32 %v447_v21, %v449_v23 }
 0x1a8   : > { %v451_v25 = vmul.f32 1.442695, %v450_v24 }
 0x1aa   : > { %1075 = vpow2.f32 %v451_v25 }
 0x1b7   : > { %v1076_v26 = vpop.eup %1075 }
 0x1b8   : > { %453 = vadd.xlane.f32.xlu0 %v1076_v26 }
 0x241   : > { %v454_v27 = vpop.xlane.xlu0 %453 }
 0x242   : > { %1077 = vrcp.f32 %v454_v27 }
 0x24f   : > { %v1078_v28 = vpop.eup %1077 }
 0x250   : > { %v457_v29 = vmul.f32 %v1078_v28, %v1076_v26 }
 0x252   : > { %989 = vmatmul.mubr.f32.vlgmr.msra.gmra.mxu1 %v457_v29  ;;  %458 = vst [vmem:[%s1379_s12] sm:$0xff] %v457_v29 }
 0x253   : > { %992 = vmatpush3.msra.mxu1 %v536_v30  ;;  %999 = vmatprep.mubr.msk.f32.mxu1 %vm1190_vm0, %v1189_v0 }
 0x254   : > { %993 = vmatprep.subr.mxu1 %v1189_v0 }
 0x255   : > { %994 = vmatpush3.msra.mxu1 %v535_v31 }
 0x256   : > { %995 = vmatprep.subr.mxu1 %v1189_v0 }
 0x257   : > { %996 = vmatpush3.msra.mxu1 %v534_v32 }
 0x258   : > { %997 = vmatprep.subr.mxu1 %v1189_v0 }
 0x259   : > { %998 = vmatpush3.msra.mxu1 %v533_v33 }
 0x25a   : > { %1000 = vmatmul.mubr.msk.f32.vlgmr.msra.gmra.mxu1 %vm322_vm1, %v305_v17  ;;  %1002 = vmatprep.subr.mxu1 %v1189_v0 }
 0x25b   : > { %1003 = vmatpush3.msra.mxu1 %v532_v34  ;;  %1010 = vmatprep.mubr.msk.f32.mxu1 %vm1190_vm0, %v1189_v0 }
 0x25c   : > { %1004 = vmatprep.subr.mxu1 %v1189_v0 }
 0x25d   : > { %1005 = vmatpush3.msra.mxu1 %v531_v35 }
 0x25e   : > { %1006 = vmatprep.subr.mxu1 %v1189_v0 }
 0x25f   : > { %1007 = vmatpush3.msra.mxu1 %v530_v36 }
 0x260   : > { %1008 = vmatprep.subr.mxu1 %v1189_v0 }
 0x261   : > { %1009 = vmatpush3.msra.mxu1 %v529_v37 }
 0x312   : > { %v525_v38 = vpop.f32.mrf.mxu1 }
 0x313   : > { %1011 = vmatmul.mubr.msk.f32.vlgmr.msra.gmra.mxu1 %vm322_vm1, %v525_v38 }
 0x314   : > { %v990_v39 = vpop.f32.mrf.mxu1 }
 0x31a   : > { %v603_v40 = vpop.f32.mrf.mxu1 }
 0x31c   : > { %v1001_v41 = vpop.f32.mrf.mxu1 }
 0x31d   : > { %1094 = shalt.err (!%p1091_p5)
}
 0x31e   : > { %s1095_s13 = scalar_lea.hbm %s722_s17, 128  ;;  %s1099_s16 = scalar_lea.hbm %s1491_s6, 256 }
 0x31f   : > { %p1096_p6 = scmp.ne.s32.totalorder %s722_s17, %s1095_s13  ;;  %p1100_p10 = scmp.lt.s32.totalorder %s722_s17, %s1491_s6 }
 0x320   : > { %p1101_p11 = scmp.lt.s32.totalorder %s1099_s16, %s1095_s13 }
 0x321   : > { %p1097_p7 = pnand %p1096_p6, %p1268_p4 }
 0x322   : > { %p1102_p12 = por %p1101_p11, %p1100_p10 }
 0x323   : > { %p1098_p9 = pneg %p1097_p7 }
 0x325   : > { %p1103_p13 = pnand %p1102_p12, %p1098_p9 }
 0x327   : > { %1106 = shalt.err (!%p1103_p13)
}
 0x328   : > { %1014 = dma.vmem_to_hbm [thread:$0]  (%p1268_p4), %s725_s18, 128, %s722_s17, %s696_s19   ;;  %v869_v43 = vld [vmem:[%s1489_s4] ss:$0 sm:$0xff] }
 0x329   : > { %s1496_s27 = sshll.u32 %s1368_s20, 3  ;;  %s1497_s11 = sshll.u32 %s1179_s24, 7 }
 0x32a   : > { %s285_s14 = scalar_lea.vmem [#allocation2], %s1496_s27  ;;  %s1443_s15 = scalar_lea.hbm %s1490_s5, %s1497_s11 }
 0x32b   : > { %s710_s8 = sshll.u32 %s285_s14, 4  ;;  %s691_s17 = scalar_lea.sflag [#allocation3], %s1368_s20  ;;  %s711_s8 = int_to_ptr.vmem [resolvable:$true] %s710_s8 }
 0x32c   : > { %s1107_s18 = scalar_lea.vmem %s711_s8, 128  ;;  %s1192_s19 = smov [#allocation2]  }
 0x32d   : > { %p1108_p0 = scmp.ne.s32.totalorder %s711_s8, %s1107_s18  ;;  %s1111_s16 = sshll.u32 %s1192_s19, 4  ;;  %s1112_s16 = int_to_ptr.vmem [resolvable:$false] %s1111_s16 }
 0x32e   : > { %s1113_s28 = scalar_lea.vmem %s1112_s16, 256  ;;  %p1114_p3 = scmp.lt.s32.totalorder %s711_s8, %s1112_s16 }
 0x32f   : > { %p1109_p1 = pnand %p1108_p0, %p1268_p4  ;;  %p1115_p5 = scmp.lt.s32.totalorder %s1113_s28, %s1107_s18 }
 0x331   : > { %p1110_p2 = pneg %p1109_p1  ;;  %p1116_p6 = por %p1115_p5, %p1114_p3 }
 0x333   : > { %p1117_p7 = pnand %p1116_p6, %p1110_p2 }
 0x3d3   : > { %v676_v42 = vpop.f32.mrf.mxu1 }
 0x3d4   : > { %v677_v44 = vadd.f32 %v676_v42, %v603_v40 }
 0x3d5   : > { %v1012_v45 = vpop.f32.mrf.mxu1 }
 0x3d6   : > { %v687_v46 = vadd.f32 %v869_v43, %v677_v44 }
 0x3d8   : > { %1079 = vtanh.f32 %v687_v46 }
 0x3e5   : > { %v1080_v47 = vpop.eup %1079 }
 0x3e6   : > { %689 = vst.msk [vmem:[%s285_s14] sm:$0xff] %vm322_vm1, %v1080_v47 }
 0x3e7   : > { %1120 = shalt.err (!%p1117_p7)
}
 0x3e8   : > { %s1121_s24 = scalar_lea.hbm %s1443_s15, 128  ;;  %s1125_s27 = scalar_lea.hbm %s1490_s5, 256 }
 0x3e9   : > { %p1122_p9 = scmp.ne.s32.totalorder %s1443_s15, %s1121_s24  ;;  %p1126_p12 = scmp.lt.s32.totalorder %s1443_s15, %s1490_s5 }
 0x3ea   : > { %p1127_p13 = scmp.lt.s32.totalorder %s1125_s27, %s1121_s24 }
 0x3eb   : > { %p1123_p10 = pnand %p1122_p9, %p1268_p4 }
 0x3ec   : > { %p1128_p0 = por %p1127_p13, %p1126_p12 }
 0x3ed   : > { %p1124_p11 = pneg %p1123_p10 }
 0x3ef   : > { %p1129_p1 = pnand %p1128_p0, %p1124_p11 }
 0x3f1   : > { %1132 = shalt.err (!%p1129_p1)
}
 0x3f2   : > { %1013 = dma.vmem_to_hbm [thread:$0]  (%p1268_p4), %s711_s8, 128, %s1443_s15, %s691_s17  }
 0x3f3 PF: > { %p1024_p2 = scmp.ge.s32.totalorder %s1187_s26, 2  ;;  %s736_s13 = sand.u32 1, %s1167_s21  }
 0x3f4   : > { %s737_s12 = scalar_lea.sflag [#allocation3], %s736_s13 }
 0x3f5   : > { %p1018_p3 = pnand %p1024_p2, %p1275_p8 }
 0x3f7   : > { %p1019_p5 = pneg %p1018_p3 }
 0x3f9   : > { %1158 = dma.done.wait (%p1019_p5), %s737_s12, 128  }
 0x3fa   : > { %1160 = vsyncadd (%p1019_p5), %s737_s12, 4294967168  ;;  %s746_s18 = scalar_lea.sflag [#allocation5], %s736_s13 }
 0x3fb   : > { %1162 = dma.done.wait (%p1019_p5), %s746_s18, 128  }
 0x3fc   : > { %1164 = vsyncadd (%p1019_p5), %s746_s18, 4294967168  ;;  %s23_s26 = sadd.s32 1, %s1187_s26   ;;  %s1498_s21 = smov %s1171_s22 }
 0x3fd   : > { %p20_p6 = scmp.ge.s32.totalorder %s23_s26, 4   ;;  %s1499_s22 = smov %s1175_s23 }
 0x3fe   : > { %s1500_s23 = smov %s1281_s10  ;;  %s1501_s24 = smov %s1183_s25 }
 0x3ff   : > { %s1502_s25 = smov %s1504_s29  ;;  %22 = sbr.rel (!%p20_p6) target bundleno = 6 (0x6), region = 95 }
 0x404   :  { %751 = vsyncpa [#allocation3], 1 }
 0x405   :  { %753 = vsyncpa [#allocation3 + $0x1], 1 }
 0x406   :  { %754 = vsyncpa [#allocation5], 1 }
 0x407   :  { %756 = vsyncpa [#allocation5 + $0x1], 1 }

</bundles_post_ra>
